<compile_context>
chip_gen: v7x
topology: tpu7x:2x2x1
jax: 0.10.0
libtpu: 0.0.40
codegen_flags: <defaults>
</compile_context>

<pallas_src>
import functools

import jax
import jax.numpy as jnp
import numpy as np
from jax import lax
from jax.experimental import pallas as pl
from jax.experimental.pallas import tpu as pltpu


# Conservative, generation-safe budgets (v7x has only 64 MiB physical VMEM).
_VMEM_LIMIT_BYTES = 48 * 1024 * 1024   # explicit: v5e's scoped default is only 16 MiB
_FUSED_LIMIT_BYTES = 6 * 1024 * 1024   # max per-batch (C, H*W) tile for the fused path
_SPLIT_TILE_BYTES = 4 * 1024 * 1024    # target spatial tile size for the split path


# ----------------------------------------------------------------------------
# Fused kernel: avg/max pool + MLP + scale while the (C, HW) tile is resident.
# ----------------------------------------------------------------------------
def _fused_kernel(x_ref, w1_ref, w2_ref, out_ref, *, inv_hw):
    # x_ref : (1, C, HW) one full batch element
    # w1_ref: (hidden, C) fc1 weight (f32, no bias)
    # w2_ref: (C, hidden) fc2 weight (f32, no bias)
    x = x_ref[0]                                                     # (C, HW)
    s = jnp.sum(x.astype(jnp.float32), axis=-1, keepdims=True)       # (C, 1) f32 acc
    m = jnp.max(x, axis=-1, keepdims=True).astype(jnp.float32)       # (C, 1) f32

    w1 = w1_ref[...]                                                 # (hidden, C)
    w2 = w2_ref[...]                                                 # (C, hidden)

    def branch(v):                                                   # v: (C, 1) f32
        h = jnp.maximum(jnp.dot(w1, v, preferred_element_type=jnp.float32), 0.0)
        o = jnp.dot(w2, h, preferred_element_type=jnp.float32)
        return jax.nn.sigmoid(o)

    att = branch(s * inv_hw) + branch(m)                             # (C, 1) f32
    # Multiply in the input dtype (bf16 stays bf16 on v6e/v7x).
    out_ref[0] = x * att.astype(x.dtype)


# ----------------------------------------------------------------------------
# Split path, kernel 1: tiled global sum/max pooling (pure reduction).
# Accumulates directly into the resident (1, C, 1) output blocks across the
# sequential ("arbitrary") spatial grid axis.  Padded tail columns are masked.
# ----------------------------------------------------------------------------
def _pool_kernel(x_ref, sum_ref, max_ref, *, t_hw, hw, mask_tail):
    j = pl.program_id(1)

    @pl.when(j == 0)
    def _init():
        sum_ref[...] = jnp.zeros_like(sum_ref)
        max_ref[...] = jnp.full_like(max_ref, -jnp.inf)

    xt = x_ref[0].astype(jnp.float32)                                # (C, T_HW)
    if mask_tail:
        rem = hw - j * t_hw                                          # valid cols in tile
        col = lax.broadcasted_iota(jnp.int32, xt.shape, 1)
        valid = col < rem
        xs = jnp.where(valid, xt, 0.0)
        xm = jnp.where(valid, xt, -jnp.inf)
    else:
        xs = xt
        xm = xt

    sum_ref[0] += jnp.sum(xs, axis=-1, keepdims=True)                # (C, 1)
    max_ref[0] = jnp.maximum(max_ref[0], jnp.max(xm, axis=-1, keepdims=True))


# ----------------------------------------------------------------------------
# Split path, kernel 2: per-channel scaling  out = x * att  (fully parallel grid).
# Pallas only writes the in-bounds part of a padded tail output block, so no
# explicit masking is needed here.
# ----------------------------------------------------------------------------
def _scale_kernel(x_ref, att_ref, out_ref):
    x = x_ref[0]                                                     # (C, T_HW)
    att = att_ref[0]                                                 # (C, 1) f32
    out_ref[0] = x * att.astype(x.dtype)


# ----------------------------------------------------------------------------
# Wrapper
# ----------------------------------------------------------------------------
def _split_tile_cols(hw, c, itemsize, target_bytes):
    """Spatial tile width: ~target_bytes per tile, multiple of 128 (or full HW)."""
    cols = max(1, target_bytes // max(1, c * itemsize))
    cols = max(128, (cols // 128) * 128)
    if cols >= hw:
        return hw          # single block == full dim is always a legal block shape
    return cols


def channel_attention_forward(x, params, *,
                              fused_limit_bytes=_FUSED_LIMIT_BYTES,
                              split_tile_bytes=_SPLIT_TILE_BYTES,
                              vmem_limit_bytes=_VMEM_LIMIT_BYTES):
    b, c, H, W = x.shape
    hw = H * W
    w1 = params["fc1"].astype(jnp.float32)       # (hidden, C) = Linear(C, C//r).weight
    w2 = params["fc2"].astype(jnp.float32)       # (C, hidden) = Linear(C//r, C).weight
    hidden = w1.shape[0]
    itemsize = jnp.dtype(x.dtype).itemsize
    inv_hw = 1.0 / hw

    # (b, C, H, W) -> (b, C, H*W): channels on sublanes, spatial on lanes.
    # Pure reshape: no transpose, no padding, no extra HBM pass.
    x_l = x.reshape(b, c, hw)

    # ---------------- Fused single-pass path (1 read + 1 write of x) ----------------
    if c * hw * itemsize <= fused_limit_bytes:
        out = pl.pallas_call(
            functools.partial(_fused_kernel, inv_hw=inv_hw),
            out_shape=jax.ShapeDtypeStruct((b, c, hw), x.dtype),
            grid=(b,),
            in_specs=[
                pl.BlockSpec((1, c, hw), lambda i: (i, 0, 0)),
                pl.BlockSpec((hidden, c), lambda i: (0, 0)),
                pl.BlockSpec((c, hidden), lambda i: (0, 0)),
            ],
            out_specs=pl.BlockSpec((1, c, hw), lambda i: (i, 0, 0)),
            compiler_params=pltpu.CompilerParams(
                dimension_semantics=("parallel",),
                vmem_limit_bytes=vmem_limit_bytes),
        )(x_l, w1, w2)
        return out.reshape(b, c, H, W)

    # ---------------- Split path for large images ----------------
    t_hw = _split_tile_cols(hw, c, itemsize, split_tile_bytes)
    n_hw = pl.cdiv(hw, t_hw)
    mask_tail = (hw % t_hw) != 0

    # Note: the HW grid axis must stay "arbitrary" (sequential) because the output
    # blocks are used as accumulators.  A v7x dual-TC variant would instead emit
    # per-chunk partial reductions with a fully parallel grid.
    sums, maxs = pl.pallas_call(
        functools.partial(_pool_kernel, t_hw=t_hw, hw=hw, mask_tail=mask_tail),
        out_shape=(jax.ShapeDtypeStruct((b, c, 1), jnp.float32),
                   jax.ShapeDtypeStruct((b, c, 1), jnp.float32)),
        grid=(b, n_hw),
        in_specs=[pl.BlockSpec((1, c, t_hw), lambda i, j: (i, 0, j))],
        out_specs=(pl.BlockSpec((1, c, 1), lambda i, j: (i, 0, 0)),
                   pl.BlockSpec((1, c, 1), lambda i, j: (i, 0, 0))),
        compiler_params=pltpu.CompilerParams(
            dimension_semantics=("parallel", "arbitrary"),
            vmem_limit_bytes=vmem_limit_bytes),
    )(x_l)

    # Tiny squeeze-excite MLP, batched over b in plain XLA (no N=1 matmuls in-kernel).
    avg = sums[..., 0] * inv_hw                    # (b, C) f32
    mx = maxs[..., 0]                              # (b, C) f32

    def mlp(v):
        h = jnp.maximum(v @ w1.T, 0.0)             # (b, hidden)
        return jax.nn.sigmoid(h @ w2.T)            # (b, C)

    att = (mlp(avg) + mlp(mx))[..., None]          # (b, C, 1) f32

    out = pl.pallas_call(
        _scale_kernel,
        out_shape=jax.ShapeDtypeStruct((b, c, hw), x.dtype),
        grid=(b, n_hw),
        in_specs=[
            pl.BlockSpec((1, c, t_hw), lambda i, j: (i, 0, j)),
            pl.BlockSpec((1, c, 1), lambda i, j: (i, 0, 0)),
        ],
        out_specs=pl.BlockSpec((1, c, t_hw), lambda i, j: (i, 0, j)),
        compiler_params=pltpu.CompilerParams(
            dimension_semantics=("parallel", "parallel"),
            vmem_limit_bytes=vmem_limit_bytes),
    )(x_l, att)

    return out.reshape(b, c, H, W)


# ----------------------------------------------------------------------------
# Pure-JAX reference (mirrors the PyTorch forward exactly)
# ----------------------------------------------------------------------------
def channel_attention_reference(x, params):
    xf = x.astype(jnp.float32)
    avg = xf.mean(axis=(2, 3))                     # (b, C)
    mx = xf.max(axis=(2, 3))                       # (b, C)

    def mlp(v):
        h = jnp.maximum(v @ params["fc1"].T.astype(jnp.float32), 0.0)
        return jax.nn.sigmoid(h @ params["fc2"].T.astype(jnp.float32))

    att = mlp(avg) + mlp(mx)                       # (b, C)
    return (xf * att[:, :, None, None]).astype(x.dtype)


if __name__ == "__main__":
    # ChannelAttention(in_channels=64, reduction_ratio=16)
    b, c, H, W = 2, 64, 16, 16
    reduction = 16
    hidden = c // reduction                        # 4

    key = jax.random.PRNGKey(0)
    k0, k1, k2, k3 = jax.random.split(key, 4)
    x = jax.random.normal(k0, (b, c, H, W), jnp.float32)
    params = {
        "fc1": 0.2 * jax.random.normal(k1, (hidden, c), jnp.float32),  # Linear(C, C//16)
        "fc2": 0.2 * jax.random.normal(k2, (c, hidden), jnp.float32),  # Linear(C//16, C)
    }

    # 1) Fused single-pass path (default budgets; the whole (C, HW) tile fits VMEM).
    out = jax.block_until_ready(channel_attention_forward(x, params))
    ref = channel_attention_reference(x, params)
    assert out.shape == (b, c, H, W), out.shape
    np.testing.assert_allclose(np.asarray(out), np.asarray(ref), rtol=1e-4, atol=1e-4)

    # 2) Split path with a non-divisible spatial tail (masked cdiv tiling):
    #    H*W = 255 with 128-wide tiles -> 2 tiles, last one padded and masked.
    x2 = jax.random.normal(k3, (b, c, 17, 15), jnp.float32)
    out2 = jax.block_until_ready(channel_attention_forward(
        x2, params, fused_limit_bytes=0, split_tile_bytes=128 * c * 4))
    ref2 = channel_attention_reference(x2, params)
    np.testing.assert_allclose(np.asarray(out2), np.asarray(ref2), rtol=1e-4, atol=1e-4)

    # 3) bf16 fused path: halves HBM traffic on this memory-bound op; f32 pooling/MLP.
    x_bf = x.astype(jnp.bfloat16)
    out_bf = jax.block_until_ready(channel_attention_forward(x_bf, params))
    ref_bf = channel_attention_reference(x_bf, params)
    np.testing.assert_allclose(np.asarray(out_bf.astype(jnp.float32)),
                               np.asarray(ref_bf.astype(jnp.float32)),
                               rtol=2e-2, atol=2e-2)

    # 4) bf16 split path with masked tail.
    x2_bf = x2.astype(jnp.bfloat16)
    out2_bf = jax.block_until_ready(channel_attention_forward(
        x2_bf, params, fused_limit_bytes=0, split_tile_bytes=128 * c * 2))
    ref2_bf = channel_attention_reference(x2_bf, params)
    np.testing.assert_allclose(np.asarray(out2_bf.astype(jnp.float32)),
                               np.asarray(ref2_bf.astype(jnp.float32)),
                               rtol=2e-2, atol=2e-2)

    print("KERNEL_OK")
</pallas_src>

<mosaic_0001>
module attributes {stable_mosaic.version = 11 : i64} {
  func.func @_fused_kernel(%arg0: i32, %arg1: memref<1x64x256xf32, #tpu.memory_space<vmem>>, %arg2: memref<4x64xf32, #tpu.memory_space<vmem>>, %arg3: memref<64x4xf32, #tpu.memory_space<vmem>>, %arg4: memref<1x64x256xf32, #tpu.memory_space<vmem>>) attributes {dimension_semantics = [#tpu.dimension_semantics<parallel>], iteration_bounds = array<i64: 2>, scalar_prefetch = 0 : i64, scratch_operands = 0 : i64, tpu.core_type = #tpu.core_type<tc>, window_params = [{transform_indices = @transform_0, window_bounds = array<i64: 1, 64, 256>}, {pipeline_mode = #tpu.pipeline_mode<synchronous>, transform_indices = @transform_1, window_bounds = array<i64: 4, 64>}, {pipeline_mode = #tpu.pipeline_mode<synchronous>, transform_indices = @transform_2, window_bounds = array<i64: 64, 4>}, {transform_indices = @transform_3, window_bounds = array<i64: 1, 64, 256>}]} {
    %c0 = arith.constant 0 : index
    %c0_0 = arith.constant 0 : index
    %c0_1 = arith.constant 0 : index
    %0 = vector.load %arg1[%c0, %c0_0, %c0_1] : memref<1x64x256xf32, #tpu.memory_space<vmem>>, vector<1x64x256xf32>
    %1 = vector.shape_cast %0 : vector<1x64x256xf32> to vector<64x256xf32>
    %cst = arith.constant dense<0.000000e+00> : vector<64xf32>
    %2 = vector.multi_reduction <add>, %1, %cst [1] : vector<64x256xf32> to vector<64xf32>
    %3 = vector.shape_cast %2 : vector<64xf32> to vector<64x1xf32>
    %cst_2 = arith.constant dense<0xFF800000> : vector<64xf32>
    %4 = vector.multi_reduction <maximumf>, %1, %cst_2 [1] : vector<64x256xf32> to vector<64xf32>
    %5 = vector.shape_cast %4 : vector<64xf32> to vector<64x1xf32>
    %c0_3 = arith.constant 0 : index
    %c0_4 = arith.constant 0 : index
    %6 = vector.load %arg2[%c0_3, %c0_4] : memref<4x64xf32, #tpu.memory_space<vmem>>, vector<4x64xf32>
    %c0_5 = arith.constant 0 : index
    %c0_6 = arith.constant 0 : index
    %7 = vector.load %arg3[%c0_5, %c0_6] : memref<64x4xf32, #tpu.memory_space<vmem>>, vector<64x4xf32>
    %cst_7 = arith.constant 3.906250e-03 : f32
    %8 = vector.broadcast %cst_7 : f32 to vector<64x1xf32>
    %9 = arith.mulf %3, %8 : vector<64x1xf32>
    %cst_8 = arith.constant dense<0.000000e+00> : vector<4x1xf32>
    %10 = tpu.matmul %6, %9, %cst_8 {dimension_numbers = #tpu.dot_dimension_numbers<[1], [0], [0], [1], [0, 0, 1, 1], [], []>} : vector<4x64xf32>, vector<64x1xf32>, vector<4x1xf32> -> vector<4x1xf32>
    %cst_9 = arith.constant 0.000000e+00 : f32
    %11 = vector.broadcast %cst_9 : f32 to vector<4x1xf32>
    %12 = arith.maximumf %10, %11 : vector<4x1xf32>
    %cst_10 = arith.constant dense<0.000000e+00> : vector<64x1xf32>
    %13 = tpu.matmul %7, %12, %cst_10 {dimension_numbers = #tpu.dot_dimension_numbers<[1], [0], [0], [1], [0, 0, 1, 1], [], []>} : vector<64x4xf32>, vector<4x1xf32>, vector<64x1xf32> -> vector<64x1xf32>
    %14 = arith.negf %13 : vector<64x1xf32>
    %15 = math.exp %14 : vector<64x1xf32>
    %cst_11 = arith.constant 1.000000e+00 : f32
    %16 = vector.broadcast %cst_11 : f32 to vector<64x1xf32>
    %17 = arith.addf %16, %15 : vector<64x1xf32>
    %18 = arith.divf %16, %17 : vector<64x1xf32>
    %cst_12 = arith.constant dense<0.000000e+00> : vector<4x1xf32>
    %19 = tpu.matmul %6, %5, %cst_12 {dimension_numbers = #tpu.dot_dimension_numbers<[1], [0], [0], [1], [0, 0, 1, 1], [], []>} : vector<4x64xf32>, vector<64x1xf32>, vector<4x1xf32> -> vector<4x1xf32>
    %cst_13 = arith.constant 0.000000e+00 : f32
    %20 = vector.broadcast %cst_13 : f32 to vector<4x1xf32>
    %21 = arith.maximumf %19, %20 : vector<4x1xf32>
    %cst_14 = arith.constant dense<0.000000e+00> : vector<64x1xf32>
    %22 = tpu.matmul %7, %21, %cst_14 {dimension_numbers = #tpu.dot_dimension_numbers<[1], [0], [0], [1], [0, 0, 1, 1], [], []>} : vector<64x4xf32>, vector<4x1xf32>, vector<64x1xf32> -> vector<64x1xf32>
    %23 = arith.negf %22 : vector<64x1xf32>
    %24 = math.exp %23 : vector<64x1xf32>
    %cst_15 = arith.constant 1.000000e+00 : f32
    %25 = vector.broadcast %cst_15 : f32 to vector<64x1xf32>
    %26 = arith.addf %25, %24 : vector<64x1xf32>
    %27 = arith.divf %25, %26 : vector<64x1xf32>
    %28 = arith.addf %18, %27 : vector<64x1xf32>
    %29 = vector.broadcast %28 : vector<64x1xf32> to vector<64x256xf32>
    %30 = arith.mulf %1, %29 : vector<64x256xf32>
    %c0_16 = arith.constant 0 : index
    %c0_17 = arith.constant 0 : index
    %c0_18 = arith.constant 0 : index
    %31 = vector.load %arg4[%c0_16, %c0_17, %c0_18] : memref<1x64x256xf32, #tpu.memory_space<vmem>>, vector<1x64x256xf32>
    %32 = vector.shape_cast %31 : vector<1x64x256xf32> to vector<64x256xf32>
    %33 = vector.shape_cast %30 : vector<64x256xf32> to vector<1x64x256xf32>
    tpu.vector_store %arg4[%c0_16, %c0_17, %c0_18], %33 {strides = array<i32>} : memref<1x64x256xf32, #tpu.memory_space<vmem>>, vector<1x64x256xf32>,
    return
  }
  func.func @transform_0(%arg0: i32) -> (i32, i32, i32) {
    %c0_i32 = arith.constant 0 : i32
    %c0_i32_0 = arith.constant 0 : i32
    %c0_i32_1 = arith.constant 0 : i32
    return %arg0, %c0_i32, %c0_i32_0 : i32, i32, i32
  }
  func.func @transform_1(%arg0: i32) -> (i32, i32) {
    %c0_i32 = arith.constant 0 : i32
    %c0_i32_0 = arith.constant 0 : i32
    %c0_i32_1 = arith.constant 0 : i32
    return %c0_i32, %c0_i32_0 : i32, i32
  }
  func.func @transform_2(%arg0: i32) -> (i32, i32) {
    %c0_i32 = arith.constant 0 : i32
    %c0_i32_0 = arith.constant 0 : i32
    %c0_i32_1 = arith.constant 0 : i32
    return %c0_i32, %c0_i32_0 : i32, i32
  }
  func.func @transform_3(%arg0: i32) -> (i32, i32, i32) {
    %c0_i32 = arith.constant 0 : i32
    %c0_i32_0 = arith.constant 0 : i32
    %c0_i32_1 = arith.constant 0 : i32
    return %arg0, %c0_i32, %c0_i32_0 : i32, i32, i32
  }
}

</mosaic_0001>

<bundles_post_ra>
// kernel: tpu_custom_call.1
= control target key start
LH: loop header
LB: loop body
LE: loop exit
PB: predicated region body
PF: predicated region fallthrough
CT: control target
= control target key end

     0   :  { %8 = vsyncpa [#allocation3], 0  ;;  %s1677_s0 = inlined_call_operand.hbm [shape: f32[2,64,256], index: 0, kind: input, shape index: {}]   ;;  %s1678_s1 = inlined_call_operand.vmem [shape: f32[4,64], index: 1, kind: input, shape index: {}]   ;;  %s1679_s2 = inlined_call_operand.vmem [shape: f32[64,4], index: 2, kind: input, shape index: {}]   ;;  %s1680_s3 = inlined_call_operand.hbm [shape: f32[2,64,256], index: 3, kind: output, shape index: {}]  }
   0x1   :  { %10 = vsyncpa [#allocation3 + $0x1], 0 }
   0x2   :  { %11 = vsyncpa [#allocation4], 0 }
   0x3   :  { %13 = vsyncpa [#allocation4 + $0x1], 0  ;;  %s1349_s12 = smov 0   ;;  %s1351_s13 = smov 0  }
   0x4   :  { %s1353_s14 = smov 0   ;;  %s1355_s15 = smov 0  }
   0x5 LB: > { %s1370_s16 = sadd.s32 4294967295, %s1317_s15   ;;  %s921_s17 = sadd.s32 4294967294, %s1317_s15   ;;  %s1317_s15 = sphi %s1355_s15, %s1693_s15   ;;  %s1313_s14 = sphi %s1353_s14, %s1692_s14   ;;  %s1309_s13 = sphi %s1351_s13, %s1691_s13   ;;  %s1305_s12 = sphi %s1349_s12, %s1690_s12  }
   0x6   : > { %s1374_s18 = sadd.s32 1, %s1317_s15   ;;  %s26_s19 = sadd.s32 1, %s1313_s14 }
   0x7   : > { %s23_s20 = ssub.s32 %s1317_s15, %s1374_s18  ;;  %p33_p0 = scmp.ne.s32.totalorder %s1313_s14, %s1309_s13 }
   0x8   : > { %p24_p1 = scmp.eq.s32.totalorder %s23_s20, 0  ;;  %p34_p2 = scmp.eq.s32.totalorder %s1317_s15, 0 }
   0x9   : > { %p39_p3 = scmp.ne.s32.totalorder %s1309_s13, %s1305_s12  ;;  %p40_p4 = scmp.eq.s32.totalorder %s1370_s16, 0 }
   0xa   : > { %s1386_s21 = scalar_select %p24_p1, %s1313_s14, %s26_s19  }
   0xb   : > { %p1388_p5 = por %p34_p2, %p33_p0  ;;  %p1392_p6 = por %p40_p4, %p39_p3 }
   0xc   : > { %p105_p7 = scmp.eq.s32.totalorder %s1370_s16, 1  ;;  %p111_p8 = scmp.eq.s32.totalorder %s921_s17, 1 }
   0xd   : > { %p1113_p10 = scmp.lt.s32.totalorder %s1317_s15, 2  ;;  %s137_s26 = sand.u32 1, %s1313_s14  }
   0xe   : > { %p1399_p11 = por %p105_p7, %p33_p0  ;;  %p1403_p12 = por %p111_p8, %p39_p3 }
   0xf   : > { %s971_s27 = sshll.u32 %s1317_s15, 11  ;;  %s924_s28 = sshll.u32 %s137_s26, 7 }
  0x10   : > { %s1684_s24 = scalar_select %p1399_p11, 1, 0 }
  0x11   : > { %s1685_s25 = scalar_select %p1403_p12, 1, 0 }
  0x12   : > { %s1412_s4 = scalar_lea.hbm %s1677_s0, %s971_s27  ;;  %s141_s5 = scalar_lea.vmem [#allocation2], %s924_s28 }
  0x13   : > { %s148_s6 = sshll.u32 %s141_s5, 4  ;;  %p1416_p13 = pnand %p1113_p10, %p1388_p5  ;;  %s1420_s6 = int_to_ptr.vmem [resolvable:$true] %s148_s6 }
  0x14   : > { %s1422_s8 = scalar_lea.sflag [#allocation3], %s137_s26  ;;  %s1221_s9 = scalar_lea.hbm %s1412_s4, 2048 }
  0x15   : > { %p1222_p0 = scmp.ne.s32.totalorder %s1412_s4, %s1221_s9  ;;  %p1223_p1 = pneg %p1416_p13 }
  0x16   : > { %s1226_s17 = scalar_lea.hbm %s1677_s0, 4096  ;;  %p1227_p4 = scmp.lt.u32.totalorder %s1412_s4, %s1677_s0 }
  0x17   : > { %p1224_p2 = pnand %p1223_p1, %p1222_p0  ;;  %p1228_p5 = scmp.lt.u32.totalorder %s1226_s17, %s1221_s9 }
  0x18   : > { %p1230_p8 = scmp.lt.u32.totalorder %s1221_s9, %s1412_s4 }
  0x19   : > { %p1225_p3 = pneg %p1224_p2  ;;  %p1229_p7 = por %p1228_p5, %p1227_p4 }
  0x1b   : > { %p1231_p10 = por %p1230_p8, %p1229_p7 }
  0x1d   : > { %p1232_p9 = pnand %p1231_p10, %p1225_p3 }
  0x1f   : > { %1235 = shalt.err (!%p1232_p9)
}
  0x20   : > { %s1236_s22 = scalar_lea.vmem %s1420_s6, 2048  ;;  %s1319_s26 = smov [#allocation2]  }
  0x21   : > { %p1237_p0 = scmp.ne.s32.totalorder %s1420_s6, %s1236_s22  ;;  %s1241_s27 = sshll.u32 %s1319_s26, 4  ;;  %s1242_s27 = int_to_ptr.vmem [resolvable:$false] %s1241_s27 }
  0x22   : > { %s1243_s28 = scalar_lea.vmem %s1242_s27, 4096  ;;  %p1244_p11 = scmp.lt.s32.totalorder %s1420_s6, %s1242_s27 }
  0x23   : > { %p1239_p2 = pnand %p1237_p0, %p1223_p1  ;;  %p1245_p4 = scmp.lt.s32.totalorder %s1243_s28, %s1236_s22 }
  0x25   : > { %p1240_p12 = pneg %p1239_p2  ;;  %p1246_p5 = por %p1245_p4, %p1244_p11 }
  0x27   : > { %p1247_p7 = pnand %p1246_p5, %p1240_p12 }
  0x29   : > { %1250 = shalt.err (!%p1247_p7)
}
  0x2a   : > { %s1320_s29 = smov 256   ;;  %s1321_s30 = smov 16  }
  0x2b   : > { %1108 = dma.hbm_to_vmem [thread:$0]  (!%p1416_p13), %s1412_s4, 2048, %s1420_s6, %s1422_s8, %s1320_s29, %s1320_s29, %s1321_s30  }
  0x2c   : > { %p927_p9 = scmp.ge.s32.totalorder %s1317_s15, 1  ;;  %p156_p1 = scmp.lt.s32.totalorder %s1317_s15, 3 }
  0x2e   : > { %p157_p3 = pnand %p927_p9, %p156_p1 }
  0x2f   : > { %s1453_s5 = sand.u32 (!%p157_p3), 1, %s1309_s13  }
  0x30   : > { %160 = sbr.rel (%p157_p3) target bundleno = 1082 (0x43a), region = 32  ;;  %s928_s9 = sshll.u32 (!%p157_p3), %s1453_s5, 7 }
  0x31   : > { %s163_s10 = scalar_lea.sflag (!%p157_p3), [#allocation3], %s1453_s5  ;;  %s166_s11 = scalar_lea.vmem (!%p157_p3), [#allocation2], %s928_s9 }
  0x37   : > { %1296 = dma.done.wait (%p1392_p6), %s163_s10, 2048  }
  0x38   : > { %1298 = vsyncadd (%p1392_p6), %s163_s10, 4294965248  ;;  %v1463_v0 = vld [vmem:[%s166_s11 + $0x20] sm:$0xff]  ;;  %v1465_v1 = vld [vmem:[%s166_s11 + $0x28] sm:$0xff]  ;;  %v1322_v24 = vmov 0.0|0.0   ;;  %vm1323_vm0 = vmmov 0   ;;  %v1324_v25 = vmov 0.0  }
  0x39   : > { %v1467_v2 = vld [vmem:[%s166_s11] sm:$0xff]  ;;  %v211_v3 = vadd.f32 %v1465_v1, %v1463_v0  ;;  %v1471_v4 = vld [vmem:[%s166_s11 + $0x8] sm:$0xff]  ;;  %v1473_v5 = vld [vmem:[%s166_s11 + $0x30] sm:$0xff]  ;;  %1075 = vmatprep.subr.bf16.mxu0 %v1322_v24  ;;  %1025 = vmatprep.mubr.msk.f32.mxu0 %vm1323_vm0, %v1324_v25  ;;  %v235_v29 = vmax.f32 %v1463_v0, %v1465_v1  ;;  %vm270_vm1 = vcmask 523264   ;;  %vm345_vm2 = vcmask 31744   ;;  %s1594_s6 = scalar_lea.vmem [#allocation5], %s928_s9 }
  0x3a   : > { %v1475_v6 = vld [vmem:[%s166_s11 + $0x38] sm:$0xff]  ;;  %v205_v7 = vadd.f32 %v1471_v4, %v1467_v2  ;;  %v1479_v8 = vld [vmem:[%s166_s11 + $0x10] sm:$0xff]  ;;  %v1491_v14 = vld [vmem:[%s166_s11 + $0x40] sm:$0xff]  ;;  %v229_v27 = vmax.f32 %v1467_v2, %v1471_v4  ;;  %vm370_vm3 = vcmask 1043456   ;;  %s972_s9 = sshll.u32 %s1370_s16, 11  ;;  %s848_s7 = sshll.u32 %s1594_s6, 4  ;;  %s1629_s7 = int_to_ptr.vmem [resolvable:$true] %s848_s7 }
  0x3b   : > { %v1481_v9 = vld [vmem:[%s166_s11 + $0x18] sm:$0xff]  ;;  %212 = vadd.xlane.f32.xlu1 %v211_v3  ;;  %v214_v10 = vadd.f32 %v1475_v6, %v1473_v5  ;;  %v1487_v12 = vld [vmem:[%s166_s11 + $0x50] sm:$0xff]  ;;  %v1493_v15 = vld [vmem:[%s166_s11 + $0x48] sm:$0xff]  ;;  %v238_v28 = vmax.f32 %v1473_v5, %v1475_v6  ;;  %s1627_s19 = scalar_lea.hbm %s1680_s3, %s972_s9  ;;  %s835_s16 = scalar_lea.sflag [#allocation4], %s1453_s5 }
  0x3c   : > { %206 = vadd.xlane.f32.xlu0 %v205_v7  ;;  %v208_v11 = vadd.f32 %v1481_v9, %v1479_v8  ;;  %v1489_v13 = vld [vmem:[%s166_s11 + $0x58] sm:$0xff]  ;;  %v217_v17 = vadd.f32 %v1493_v15, %v1491_v14  ;;  %v1499_v18 = vld [vmem:[%s166_s11 + $0x70] sm:$0xff]  ;;  %v1503_v20 = vld [vmem:[%s166_s11 + $0x60] sm:$0xff]  ;;  %v232_v26 = vmax.f32 %v1479_v8, %v1481_v9  ;;  %v241_v31 = vmax.f32 %v1491_v14, %v1493_v15  ;;  %s1251_s20 = scalar_lea.vmem %s1629_s7, 2048  ;;  %p1687_p11 = scmp.ne.s32.totalorder %s1684_s24, 0 }
  0x3d   : > { %v220_v16 = vadd.f32 %v1489_v13, %v1487_v12  ;;  %v1501_v19 = vld [vmem:[%s166_s11 + $0x78] sm:$0xff]  ;;  %v1505_v21 = vld [vmem:[%s166_s11 + $0x68] sm:$0xff]  ;;  %v244_v30 = vmax.f32 %v1487_v12, %v1489_v13  ;;  %v253_v54 = vld [vmem:[%s1678_s1] sm:$0xf]  ;;  %p1252_p6 = scmp.ne.s32.totalorder %s1629_s7, %s1251_s20  ;;  %s1326_s22 = smov [#allocation5]  }
  0x3e   : > { %v226_v22 = vadd.f32 %v1501_v19, %v1499_v18  ;;  %v223_v23 = vadd.f32 %v1505_v21, %v1503_v20  ;;  %v250_v32 = vmax.f32 %v1499_v18, %v1501_v19  ;;  %v247_v33 = vmax.f32 %v1503_v20, %v1505_v21  ;;  %v254_v55 = vld [vmem:[%s1679_s2] sm:$0xff]  ;;  %v255_v3 = vld [vmem:[%s1679_s2 + $0x8] sm:$0xff]  ;;  %v256_v7 = vld [vmem:[%s1679_s2 + $0x10] sm:$0xff]  ;;  %s1255_s26 = sshll.u32 %s1326_s22, 4  ;;  %s1256_s26 = int_to_ptr.vmem [resolvable:$false] %s1255_s26 }
  0x3f   : > { %215 = vadd.xlane.f32.xlu1 %v214_v10  ;;  %1030 = vmatprep.mubr.msk.f32.mxu1 %vm345_vm2, %v254_v55  ;;  %p1253_p12 = pnand %p1252_p6, %p1687_p11  ;;  %s1257_s27 = scalar_lea.vmem %s1256_s26, 4096 }
  0x40   : > { %209 = vadd.xlane.f32.xlu0 %v208_v11  ;;  %p1258_p8 = scmp.lt.s32.totalorder %s1629_s7, %s1256_s26  ;;  %p1259_p10 = scmp.lt.s32.totalorder %s1257_s27, %s1251_s20 }
  0x41   : > { %p1254_p13 = pneg %p1253_p12 }
  0x42   : > { %p1260_p0 = por %p1259_p10, %p1258_p8 }
  0x43   : > { %221 = vadd.xlane.f32.xlu1 %v220_v16 }
  0x44   : > { %218 = vadd.xlane.f32.xlu0 %v217_v17  ;;  %v257_v17 = vld [vmem:[%s1679_s2 + $0x18] sm:$0xff]  ;;  %p1261_p2 = pnand %p1260_p0, %p1254_p13 }
  0x47   : > { %227 = vadd.xlane.f32.xlu1 %v226_v22  ;;  %v258_v22 = vld [vmem:[%s1679_s2 + $0x20] sm:$0xff] }
  0x48   : > { %224 = vadd.xlane.f32.xlu0 %v223_v23 }
  0x4b   : > { %233 = vmax.xlane.f32.xlu1 %v232_v26  ;;  %v259_v26 = vld [vmem:[%s1679_s2 + $0x28] sm:$0xff] }
  0x4c   : > { %230 = vmax.xlane.f32.xlu0 %v229_v27 }
  0x4f   : > { %239 = vmax.xlane.f32.xlu1 %v238_v28 }
  0x50   : > { %236 = vmax.xlane.f32.xlu0 %v235_v29  ;;  %v260_v29 = vld [vmem:[%s1679_s2 + $0x30] sm:$0xff] }
  0x53   : > { %245 = vmax.xlane.f32.xlu1 %v244_v30 }
  0x54   : > { %242 = vmax.xlane.f32.xlu0 %v241_v31  ;;  %v261_v31 = vld [vmem:[%s1679_s2 + $0x38] sm:$0xff] }
  0x57   : > { %251 = vmax.xlane.f32.xlu1 %v250_v32 }
  0x58   : > { %248 = vmax.xlane.f32.xlu0 %v247_v33 }
  0xc8   : > { %v213_v34 = vpop.xlane.xlu1 %212 }
  0xc9   : > { %v207_v35 = vpop.xlane.xlu0 %206  ;;  %v264_v40 = vmul.f32 0.00390625, %v213_v34 }
  0xca   : > { %v262_v38 = vmul.f32 0.00390625, %v207_v35 }
  0xcc   : > { %v216_v36 = vpop.xlane.xlu1 %215 }
  0xcd   : > { %v210_v37 = vpop.xlane.xlu0 %209  ;;  %v265_v41 = vmul.f32 0.00390625, %v216_v36 }
  0xce   : > { %v263_v39 = vmul.f32 0.00390625, %v210_v37 }
  0xcf   : > { %v1079_v47 = vpack.c.bf16 %v265_v41, %v264_v40 }
  0xd0   : > { %v1076_v42 = vpack.c.bf16 %v263_v39, %v262_v38  ;;  %v222_v43 = vpop.xlane.xlu1 %221 }
  0xd1   : > { %v219_v44 = vpop.xlane.xlu0 %218  ;;  %v267_v45 = vmul.f32 0.00390625, %v222_v43 }
  0xd2   : > { %1077 = vmatpush3.bf16.msra.mxu0 %v1076_v42  ;;  %v266_v46 = vmul.f32 0.00390625, %v219_v44 }
  0xd3   : > { %1078 = vmatprep.subr.bf16.mxu0 %v1322_v24 }
  0xd4   : > { %v228_v48 = vpop.xlane.xlu1 %227  ;;  %v1082_v50 = vpack.c.bf16 %v267_v45, %v266_v46 }
  0xd5   : > { %v225_v49 = vpop.xlane.xlu0 %224  ;;  %v269_v51 = vmul.f32 0.00390625, %v228_v48 }
  0xd6   : > { %1080 = vmatpush3.bf16.msra.mxu0 %v1079_v47  ;;  %v268_v52 = vmul.f32 0.00390625, %v225_v49 }
  0xd7   : > { %1081 = vmatprep.subr.bf16.mxu0 %v1322_v24 }
  0xd8   : > { %v1085_v53 = vpack.c.bf16 %v269_v51, %v268_v52  ;;  %v234_v56 = vpop.xlane.xlu1 %233 }
  0xd9   : > { %v231_v57 = vpop.xlane.xlu0 %230 }
  0xda   : > { %1083 = vmatpush3.bf16.msra.mxu0 %v1082_v50  ;;  %v1088_v63 = vpack.c.bf16 %v234_v56, %v231_v57 }
  0xdb   : > { %1084 = vmatprep.subr.bf16.mxu0 %v1322_v24 }
  0xdc   : > { %v240_v58 = vpop.xlane.xlu1 %239 }
  0xdd   : > { %v237_v59 = vpop.xlane.xlu0 %236 }
  0xde   : > { %1086 = vmatpush3.bf16.msra.mxu0 %v1085_v53  ;;  %v1091_v16 = vpack.c.bf16 %v240_v58, %v237_v59 }
  0xe0   : > { %v246_v10 = vpop.xlane.xlu1 %245 }
  0xe1   : > { %1026 = vmatmul.mubr.msk.f32.vlgmr.msra.gmra.mrb[0].mxu0 %vm270_vm1, %v253_v54  ;;  %v243_v11 = vpop.xlane.xlu0 %242 }
  0xe2   : > { %1063 = vmatprep.mubr.msk.f32.mxu0 %vm345_vm2, %v254_v55  ;;  %v1094_v23 = vpack.c.bf16 %v246_v10, %v243_v11 }
  0xe4   : > { %v252_v27 = vpop.xlane.xlu1 %251 }
  0xe5   : > { %v249_v28 = vpop.xlane.xlu0 %248 }
  0xe6   : > { %v1097_v30 = vpack.c.bf16 %v252_v27, %v249_v28 }
 0x1b4   : > { %v340_v60 = vpop.f32.mrb[0].mxu0 }
 0x1b5   : > { %v344_v61 = vmax.f32 %v340_v60, 0.0  ;;  %v1027_v62 = vpop.f32.mrb[1].mxu0 }
 0x1b7   : > { %1028 = vmatprep.subr.msk.mxu1 %vm370_vm3, %v344_v61 }
 0x1b8   : > { %1029 = vmatpush3.msk.msra.mxu1 %vm370_vm3, %v344_v61 }
 0x1b9   : > { %1031 = vmatmul.mubr.msk.f32.vlgmr.msra.gmra.mrb[0].mxu1 %vm345_vm2, %v255_v3  ;;  %1087 = vmatprep.subr.bf16.mxu1 %v1322_v24 }
 0x1ba   : > { %1089 = vmatpush3.bf16.msra.mxu1 %v1088_v63  ;;  %1033 = vmatprep.mubr.msk.f32.mxu1 %vm345_vm2, %v256_v7 }
 0x1bb   : > { %1090 = vmatprep.subr.bf16.mxu1 %v1322_v24 }
 0x1bd   : > { %1034 = vmatmul.mubr.msk.f32.gmra.mrb[2].mxu1 %vm345_vm2, %v257_v17 }
 0x1be   : > { %1092 = vmatpush3.bf16.msra.mxu1 %v1091_v16  ;;  %1036 = vmatprep.mubr.msk.f32.mxu1 %vm345_vm2, %v258_v22 }
 0x1bf   : > { %1093 = vmatprep.subr.bf16.mxu1 %v1322_v24 }
 0x1c1   : > { %1037 = vmatmul.mubr.msk.f32.gmra.mrb[4].mxu1 %vm345_vm2, %v259_v26 }
 0x1c2   : > { %1095 = vmatpush3.bf16.msra.mxu1 %v1094_v23  ;;  %1039 = vmatprep.mubr.msk.f32.mxu1 %vm345_vm2, %v260_v29 }
 0x1c3   : > { %1096 = vmatprep.subr.bf16.mxu1 %v1322_v24 }
 0x1c5   : > { %1040 = vmatmul.mubr.msk.f32.gmra.mrb[6].mxu1 %vm345_vm2, %v261_v31 }
 0x1c6   : > { %1098 = vmatpush3.bf16.msra.mxu1 %v1097_v30  ;;  %1058 = vmatprep.mubr.msk.f32.mxu1 %vm1323_vm0, %v1324_v25  ;;  %v1325_v25 = vmov 0  }
 0x1c7   : > { %1156 = vset.pattern.permute.xlu1 %v1325_v25  ;;  %1155 = vset.pattern.permute.xlu0 %v1325_v25 }
 0x1c9   : > { %1059 = vmatmul.mubr.msk.f32.vlgmr.msra.gmra.mrb[8].mxu1 %vm270_vm1, %v253_v54 }
 0x1ca   : > { %1072 = vmatprep.mubr.msk.f32.mxu1 %vm345_vm2, %v260_v29 }
 0x28c   : > { %v1032_v32 = vpop.f32.mrb[0].mxu1 }
 0x28d   : > { %v440_v33 = vpop.f32.mrb[1].mxu1  ;;  %v941_v42 = vmul.f32 -1.442695, %v1032_v32 }
 0x28e   : > { %v940_v43 = vmul.f32 -1.442695, %v440_v33 }
 0x28f   : > { %1157 = vpow2.f32 %v941_v42 }
 0x290   : > { %v1035_v34 = vpop.f32.mrb[2].mxu1  ;;  %1159 = vpow2.f32 %v940_v43 }
 0x291   : > { %v450_v35 = vpop.f32.mrb[3].mxu1  ;;  %v943_v44 = vmul.f32 -1.442695, %v1035_v34 }
 0x292   : > { %v942_v45 = vmul.f32 -1.442695, %v450_v35 }
 0x293   : > { %1161 = vpow2.f32 %v943_v44 }
 0x294   : > { %v1038_v36 = vpop.f32.mrb[4].mxu1  ;;  %1163 = vpow2.f32 %v942_v45 }
 0x295   : > { %v460_v37 = vpop.f32.mrb[5].mxu1  ;;  %v945_v49 = vmul.f32 -1.442695, %v1038_v36 }
 0x296   : > { %v944_v50 = vmul.f32 -1.442695, %v460_v37 }
 0x298   : > { %v1041_v38 = vpop.f32.mrb[6].mxu1 }
 0x299   : > { %v470_v39 = vpop.f32.mrb[7].mxu1  ;;  %v947_v46 = vmul.f32 -1.442695, %v1041_v38  ;;  %v1158_v48 = vpop.eup %1157 }
 0x29a   : > { %v946_v47 = vmul.f32 -1.442695, %v470_v39  ;;  %v504_v51 = vadd.f32 1.0, %v1158_v48  ;;  %v1160_v58 = vpop.eup %1159 }
 0x29b   : > { %1165 = vpow2.f32 %v947_v46  ;;  %v503_v63 = vadd.f32 1.0, %v1160_v58 }
 0x29c   : > { %v593_v40 = vpop.f32.mrb[8].mxu1  ;;  %1167 = vpow2.f32 %v946_v47 }
 0x29d   : > { %v597_v24 = vmax.f32 %v593_v40, 0.0  ;;  %v1060_v41 = vpop.f32.mrb[9].mxu1  ;;  %1169 = vpow2.f32 %v945_v49  ;;  %v1162_v61 = vpop.eup %1161 }
 0x29e   : > { %1171 = vpow2.f32 %v944_v50  ;;  %v1164_v10 = vpop.eup %1163  ;;  %v506_v11 = vadd.f32 1.0, %v1162_v61 }
 0x29f   : > { %1061 = vmatprep.subr.msk.mxu0 %vm370_vm3, %v597_v24  ;;  %1099 = vmatprep.subr.msk.mxu1 %vm370_vm3, %v597_v24  ;;  %1173 = vrcp.f32 %v504_v51 }
 0x2a0   : > { %1062 = vmatpush3.msk.msra.mxu0 %vm370_vm3, %v597_v24  ;;  %1100 = vmatpush3.msk.msra.mxu1 %vm370_vm3, %v597_v24 }
 0x2a1   : > { %1064 = vmatmul.mubr.msk.f32.vlgmr.msra.gmra.mrb[2].mxu0 %vm345_vm2, %v255_v3  ;;  %1073 = vmatmul.mubr.msk.f32.vlgmr.msra.gmra.mrb[10].mxu1 %vm345_vm2, %v261_v31 }
 0x2a2   : > { %1066 = vmatprep.mubr.msk.f32.mxu0 %vm345_vm2, %v256_v7 }
 0x2a5   : > { %1067 = vmatmul.mubr.msk.f32.gmra.mrb[4].mxu0 %vm345_vm2, %v257_v17  ;;  %v1166_v17 = vpop.eup %1165 }
 0x2a6   : > { %1069 = vmatprep.mubr.msk.f32.mxu0 %vm345_vm2, %v258_v22  ;;  %v1168_v22 = vpop.eup %1167  ;;  %v510_v30 = vadd.f32 1.0, %v1166_v17 }
 0x2a7   : > { %v1170_v29 = vpop.eup %1169  ;;  %v509_v33 = vadd.f32 1.0, %v1168_v22 }
 0x2a8   : > { %v1172_v32 = vpop.eup %1171  ;;  %v508_v43 = vadd.f32 1.0, %v1170_v29 }
 0x2a9   : > { %1070 = vmatmul.mubr.msk.f32.gmra.mrb[6].mxu0 %vm345_vm2, %v259_v26  ;;  %v505_v26 = vadd.f32 1.0, %v1164_v10  ;;  %v1174_v34 = vpop.eup %1173  ;;  %v507_v46 = vadd.f32 1.0, %v1172_v32 }
 0x374   : > { %v1065_v52 = vpop.f32.mrb[2].mxu0  ;;  %v1074_v53 = vpop.f32.mrb[10].mxu1 }
 0x375   : > { %v959_v54 = vmul.f32 -1.442695, %v1065_v52  ;;  %v965_v55 = vmul.f32 -1.442695, %v1074_v53  ;;  %v667_v56 = vpop.f32.mrb[3].mxu0  ;;  %v697_v57 = vpop.f32.mrb[11].mxu1 }
 0x376   : > { %v958_v59 = vmul.f32 -1.442695, %v667_v56  ;;  %v964_v60 = vmul.f32 -1.442695, %v697_v57 }
 0x377   : > { %1175 = vpow2.f32 %v959_v54 }
 0x378   : > { %1177 = vpow2.f32 %v965_v55  ;;  %v1068_v62 = vpop.f32.mrb[4].mxu0 }
 0x379   : > { %1179 = vpow2.f32 %v958_v59  ;;  %v961_v3 = vmul.f32 -1.442695, %v1068_v62  ;;  %v677_v7 = vpop.f32.mrb[5].mxu0 }
 0x37a   : > { %1181 = vpow2.f32 %v964_v60  ;;  %v960_v16 = vmul.f32 -1.442695, %v677_v7 }
 0x37b   : > { %1183 = vpow2.f32 %v961_v3 }
 0x37c   : > { %1185 = vpow2.f32 %v960_v16  ;;  %v1071_v23 = vpop.f32.mrb[6].mxu0 }
 0x37d   : > { %1187 = vrcp.f32 %v503_v63  ;;  %v963_v27 = vmul.f32 -1.442695, %v1071_v23  ;;  %v687_v28 = vpop.f32.mrb[7].mxu0 }
 0x37e   : > { %1189 = vrcp.f32 %v506_v11  ;;  %v962_v31 = vmul.f32 -1.442695, %v687_v28 }
 0x37f   : > { %1191 = vpow2.f32 %v963_v27 }
 0x380   : > { %1193 = vpow2.f32 %v962_v31 }
 0x381   : > { %v1176_v35 = vpop.eup %1175  ;;  %1195 = vrcp.f32 %v505_v26 }
 0x382   : > { %v1178_v36 = vpop.eup %1177  ;;  %1197 = vrcp.f32 %v510_v30  ;;  %v731_v37 = vadd.f32 1.0, %v1176_v35 }
 0x383   : > { %v1180_v38 = vpop.eup %1179  ;;  %1199 = vrcp.f32 %v509_v33  ;;  %v737_v39 = vadd.f32 1.0, %v1178_v36 }
 0x384   : > { %v1182_v40 = vpop.eup %1181  ;;  %1201 = vrcp.f32 %v731_v37  ;;  %v730_v24 = vadd.f32 1.0, %v1180_v38 }
 0x385   : > { %v1184_v41 = vpop.eup %1183  ;;  %1203 = vrcp.f32 %v737_v39  ;;  %v736_v25 = vadd.f32 1.0, %v1182_v40 }
 0x386   : > { %v1186_v42 = vpop.eup %1185  ;;  %1205 = vrcp.f32 %v730_v24  ;;  %v733_v44 = vadd.f32 1.0, %v1184_v41 }
 0x387   : > { %v1188_v45 = vpop.eup %1187  ;;  %1207 = vrcp.f32 %v736_v25  ;;  %v732_v47 = vadd.f32 1.0, %v1186_v42 }
 0x388   : > { %v1190_v48 = vpop.eup %1189  ;;  %1209 = vrcp.f32 %v733_v44 }
 0x389   : > { %v1192_v49 = vpop.eup %1191  ;;  %1211 = vrcp.f32 %v732_v47 }
 0x38a   : > { %v1194_v50 = vpop.eup %1193  ;;  %1213 = vrcp.f32 %v508_v43  ;;  %v735_v51 = vadd.f32 1.0, %v1192_v49 }
 0x38b   : > { %v1196_v52 = vpop.eup %1195  ;;  %1215 = vrcp.f32 %v507_v46  ;;  %v734_v53 = vadd.f32 1.0, %v1194_v50 }
 0x38c   : > { %v1198_v54 = vpop.eup %1197  ;;  %1217 = vrcp.f32 %v735_v51 }
 0x38d   : > { %v1200_v55 = vpop.eup %1199  ;;  %1219 = vrcp.f32 %v734_v53 }
 0x38e   : > { %v1202_v56 = vpop.eup %1201 }
 0x38f   : > { %v1204_v57 = vpop.eup %1203  ;;  %v755_v58 = vadd.f32 %v1202_v56, %v1174_v34 }
 0x390   : > { %v1206_v59 = vpop.eup %1205  ;;  %v761_v60 = vadd.f32 %v1204_v57, %v1198_v54 }
 0x391   : > { %v1208_v61 = vpop.eup %1207  ;;  %769 = vperm.xlu1 %1156, %v755_v58   ;;  %v754_v62 = vadd.f32 %v1206_v59, %v1188_v45 }
 0x392   : > { %v1210_v63 = vpop.eup %1209  ;;  %v760_v3 = vadd.f32 %v1208_v61, %v1200_v55 }
 0x393   : > { %v1212_v7 = vpop.eup %1211  ;;  %764 = vperm.xlu0 %1155, %v754_v62   ;;  %v757_v10 = vadd.f32 %v1210_v63, %v1190_v48 }
 0x394   : > { %v1214_v11 = vpop.eup %1213  ;;  %v756_v16 = vadd.f32 %v1212_v7, %v1196_v52 }
 0x395   : > { %v1216_v17 = vpop.eup %1215  ;;  %794 = vperm.xlu1 %1156, %v760_v3  }
 0x396   : > { %v1218_v22 = vpop.eup %1217 }
 0x397   : > { %v1220_v23 = vpop.eup %1219  ;;  %v759_v26 = vadd.f32 %v1218_v22, %v1214_v11 }
 0x398   : > { %v758_v27 = vadd.f32 %v1220_v23, %v1216_v17 }
 0x399   : > { %779 = vperm.xlu1 %1156, %v757_v10  }
 0x39d   : > { %774 = vperm.xlu1 %1156, %v756_v16  }
 0x3a1   : > { %789 = vperm.xlu1 %1156, %v759_v26  }
 0x3a5   : > { %784 = vperm.xlu1 %1156, %v758_v27  }
 0x3a9   : > { %799 = vperm.xlu1 %1156, %v761_v60  }
 0x410   : > { %v770_v28 = vpop.permute.xlu1 %769 }
 0x411   : > { %v804_v29 = vmul.f32 %v770_v28, %v1479_v8  ;;  %v805_v30 = vmul.f32 %v770_v28, %v1481_v9 }
 0x412   : > { %v765_v31 = vpop.permute.xlu0 %764 }
 0x413   : > { %820 = vst [vmem:[%s1594_s6 + $0x10] sm:$0xff] %v804_v29  ;;  %821 = vst [vmem:[%s1594_s6 + $0x18] sm:$0xff] %v805_v30  ;;  %v802_v32 = vmul.f32 %v765_v31, %v1467_v2  ;;  %v803_v8 = vmul.f32 %v765_v31, %v1471_v4 }
 0x414   : > { %v795_v9 = vpop.permute.xlu1 %794 }
 0x415   : > { %818 = vst [vmem:[%s1594_s6] sm:$0xff] %v802_v32  ;;  %819 = vst [vmem:[%s1594_s6 + $0x8] sm:$0xff] %v803_v8  ;;  %v814_v33 = vmul.f32 %v795_v9, %v1503_v20  ;;  %v815_v34 = vmul.f32 %v795_v9, %v1505_v21 }
 0x417   : > { %830 = vst [vmem:[%s1594_s6 + $0x60] sm:$0xff] %v814_v33  ;;  %831 = vst [vmem:[%s1594_s6 + $0x68] sm:$0xff] %v815_v34 }
 0x418   : > { %v780_v35 = vpop.permute.xlu1 %779 }
 0x419   : > { %v808_v36 = vmul.f32 %v780_v35, %v1473_v5  ;;  %v809_v2 = vmul.f32 %v780_v35, %v1475_v6 }
 0x41b   : > { %824 = vst [vmem:[%s1594_s6 + $0x30] sm:$0xff] %v808_v36  ;;  %825 = vst [vmem:[%s1594_s6 + $0x38] sm:$0xff] %v809_v2 }
 0x41c   : > { %v775_v4 = vpop.permute.xlu1 %774 }
 0x41d   : > { %v806_v20 = vmul.f32 %v775_v4, %v1463_v0  ;;  %v807_v21 = vmul.f32 %v775_v4, %v1465_v1 }
 0x41f   : > { %822 = vst [vmem:[%s1594_s6 + $0x20] sm:$0xff] %v806_v20  ;;  %823 = vst [vmem:[%s1594_s6 + $0x28] sm:$0xff] %v807_v21 }
 0x420   : > { %v790_v37 = vpop.permute.xlu1 %789 }
 0x421   : > { %v812_v38 = vmul.f32 %v790_v37, %v1487_v12  ;;  %v813_v5 = vmul.f32 %v790_v37, %v1489_v13 }
 0x423   : > { %828 = vst [vmem:[%s1594_s6 + $0x50] sm:$0xff] %v812_v38  ;;  %829 = vst [vmem:[%s1594_s6 + $0x58] sm:$0xff] %v813_v5 }
 0x424   : > { %v785_v6 = vpop.permute.xlu1 %784 }
 0x425   : > { %v810_v39 = vmul.f32 %v785_v6, %v1491_v14  ;;  %v811_v0 = vmul.f32 %v785_v6, %v1493_v15 }
 0x427   : > { %826 = vst [vmem:[%s1594_s6 + $0x40] sm:$0xff] %v810_v39  ;;  %827 = vst [vmem:[%s1594_s6 + $0x48] sm:$0xff] %v811_v0 }
 0x428   : > { %v800_v1 = vpop.permute.xlu1 %799 }
 0x429   : > { %v816_v12 = vmul.f32 %v800_v1, %v1499_v18  ;;  %v817_v13 = vmul.f32 %v800_v1, %v1501_v19 }
 0x42b   : > { %832 = vst [vmem:[%s1594_s6 + $0x70] sm:$0xff] %v816_v12  ;;  %833 = vst [vmem:[%s1594_s6 + $0x78] sm:$0xff] %v817_v13 }
 0x42c   : > { %1264 = shalt.err (!%p1261_p2)
}
 0x42d   : > { %s1265_s28 = scalar_lea.hbm %s1627_s19, 2048  ;;  %s1269_s10 = scalar_lea.hbm %s1680_s3, 4096 }
 0x42e   : > { %p1266_p4 = scmp.ne.s32.totalorder %s1627_s19, %s1265_s28  ;;  %p1270_p9 = scmp.lt.u32.totalorder %s1627_s19, %s1680_s3 }
 0x42f   : > { %p1271_p1 = scmp.lt.u32.totalorder %s1269_s10, %s1265_s28  ;;  %p1273_p6 = scmp.lt.u32.totalorder %s1265_s28, %s1627_s19 }
 0x430   : > { %p1267_p5 = pnand %p1266_p4, %p1687_p11 }
 0x431   : > { %p1272_p3 = por %p1271_p1, %p1270_p9 }
 0x432   : > { %p1268_p7 = pneg %p1267_p5 }
 0x433   : > { %p1274_p12 = por %p1273_p6, %p1272_p3 }
 0x435   : > { %p1275_p13 = pnand %p1274_p12, %p1268_p7 }
 0x437   : > { %1278 = shalt.err (!%p1275_p13)
}
 0x438   : > { %s1327_s4 = smov 256   ;;  %s1328_s6 = smov 16  }
 0x439   : > { %1103 = dma.vmem_to_hbm [thread:$0]  (%p1687_p11), %s1629_s7, 2048, %s1627_s19, %s835_s16, %s1327_s4, %s1327_s4, %s1328_s6  }
 0x43a PF: > { %s863_s9 = sand.u32 1, %s1305_s12   ;;  %p1688_p8 = scmp.ne.s32.totalorder %s1685_s25, 0 }
 0x43b   : > { %p1689_p10 = scmp.ge.s32.totalorder %s1317_s15, 2  ;;  %s864_s8 = scalar_lea.sflag [#allocation4], %s863_s9 }
 0x43d   : > { %p1110_p0 = pnand %p1689_p10, %p1688_p8 }
 0x43f   : > { %1300 = dma.done.wait (!%p1110_p0), %s864_s8, 2048  }
 0x440   : > { %1302 = vsyncadd (!%p1110_p0), %s864_s8, 4294965248  ;;  %p16_p2 = scmp.ge.s32.totalorder %s1374_s18, 4   ;;  %s1690_s12 = smov %s1309_s13 }
 0x441   : > { %s1691_s13 = smov %s1313_s14  ;;  %s1692_s14 = smov %s1386_s21 }
 0x442   : > { %s1693_s15 = smov %s1374_s18  ;;  %18 = sbr.rel (!%p16_p2) target bundleno = 5 (0x5), region = 77 }
 0x449   :  { %869 = vsyncpa [#allocation3], 1 }
 0x44a   :  { %871 = vsyncpa [#allocation3 + $0x1], 1 }
 0x44b   :  { %872 = vsyncpa [#allocation4], 1 }
 0x44c   :  { %874 = vsyncpa [#allocation4 + $0x1], 1 }

</bundles_post_ra>
